<compile_context>
chip_gen: v7x
topology: tpu7x:2x2x1
jax: 0.10.0
libtpu: 0.0.40
codegen_flags: <defaults>
</compile_context>

<pallas_src>
import jax
import jax.numpy as jnp
from jax.experimental import pallas as pl
from jax.experimental.pallas import tpu as pltpu


def _temp_scale_kernel(temp_ref, x_ref, w_ref, b_ref, o_ref):
    # Temperature lives in SMEM; reciprocal computed ONCE on the scalar path,
    # then broadcast-multiplied (VALU) over the (M, C) logits tile.
    inv_t = 1.0 / temp_ref[0]
    logits = jnp.dot(x_ref[...], w_ref[...], preferred_element_type=jnp.float32)
    logits = logits + b_ref[...]                      # (M, C) + (1, C) broadcast
    o_ref[...] = (logits * inv_t).astype(o_ref.dtype)


def model_with_temperature_forward(x, w, b, temperature):
    """Batched-episode forward.

    x:           (E, B, D) f32  -- E few-shot episodes, B = n_way * n_query rows
    w:           (D, C)    f32  -- stub backbone head weight (C = n_way)
    b:           (1, C)    f32  -- stub backbone head bias
    temperature: (1,)      f32  -- Platt-scaling temperature parameter
    returns:     (E, B, C) f32  logits / temperature
    """
    E, B, D = x.shape
    C = w.shape[1]
    M = E * B

    # Collapse episodes into the M dimension (metadata-only reshape, no copy).
    x2d = x.reshape(M, D)

    cost = pl.CostEstimate(
        flops=2 * M * D * C,
        transcendentals=0,
        bytes_accessed=4 * (M * D + D * C + C + M * C + 1),
    )

    out2d = pl.pallas_call(
        _temp_scale_kernel,
        out_shape=jax.ShapeDtypeStruct((M, C), jnp.float32),
        in_specs=[
            pl.BlockSpec(memory_space=pltpu.MemorySpace.SMEM),   # temperature
            pl.BlockSpec(memory_space=pltpu.MemorySpace.VMEM),   # x (flattened)
            pl.BlockSpec(memory_space=pltpu.MemorySpace.VMEM),   # w
            pl.BlockSpec(memory_space=pltpu.MemorySpace.VMEM),   # b
        ],
        out_specs=pl.BlockSpec(memory_space=pltpu.MemorySpace.VMEM),
        cost_estimate=cost,
    )(temperature, x2d, w, b)

    return out2d.reshape(E, B, C)


if __name__ == "__main__":
    # Few-shot sizes implied by the module: n_way classes, n_query=15 queries
    # per class -> batch = n_way * n_query rows of logits over n_way classes.
    # Multiple episodes are batched into a single pallas_call.
    n_way = 5
    n_query = 15
    B = n_way * n_query          # 75
    D = 32                       # synthetic feature dim
    E = 4                        # episodes batched per call

    key = jax.random.PRNGKey(0)
    kx, kw = jax.random.split(key)
    x = jax.random.normal(kx, (E, B, D), dtype=jnp.float32)
    w = jax.random.normal(kw, (D, n_way), dtype=jnp.float32) * 0.1
    b = jnp.zeros((1, n_way), dtype=jnp.float32)

    # nn.Parameter(torch.ones(1)); use a non-trivial calibrated value to
    # actually exercise the temperature-scaling path.
    temperature = jnp.full((1,), 1.5, dtype=jnp.float32)

    out = model_with_temperature_forward(x, w, b, temperature)
    out = jax.block_until_ready(out)

    # Reference check in plain JAX.
    ref = (x @ w + b) / temperature[0]
    assert out.shape == (E, B, n_way)
    assert jnp.allclose(out, ref, atol=1e-5, rtol=1e-5)

    print("KERNEL_OK")
</pallas_src>

<mosaic_0001>
module attributes {stable_mosaic.version = 11 : i64} {
  func.func @_temp_scale_kernel(%arg0: memref<1xf32, #tpu.memory_space<smem>>, %arg1: memref<300x32xf32, #tpu.memory_space<vmem>>, %arg2: memref<32x5xf32, #tpu.memory_space<vmem>>, %arg3: memref<1x5xf32, #tpu.memory_space<vmem>>, %arg4: memref<300x5xf32, #tpu.memory_space<vmem>>) attributes {dimension_semantics = [], scalar_prefetch = 0 : i64, scratch_operands = 0 : i64, tpu.core_type = #tpu.core_type<tc>} {
    %c0 = arith.constant 0 : index
    %0 = memref.load %arg0[%c0] : memref<1xf32, #tpu.memory_space<smem>>
    %cst = arith.constant 1.000000e+00 : f32
    %1 = arith.divf %cst, %0 : f32
    %c0_0 = arith.constant 0 : index
    %c0_1 = arith.constant 0 : index
    %2 = vector.load %arg1[%c0_0, %c0_1] : memref<300x32xf32, #tpu.memory_space<vmem>>, vector<300x32xf32>
    %c0_2 = arith.constant 0 : index
    %c0_3 = arith.constant 0 : index
    %3 = vector.load %arg2[%c0_2, %c0_3] : memref<32x5xf32, #tpu.memory_space<vmem>>, vector<32x5xf32>
    %cst_4 = arith.constant dense<0.000000e+00> : vector<300x5xf32>
    %4 = tpu.matmul %2, %3, %cst_4 {dimension_numbers = #tpu.dot_dimension_numbers<[1], [0], [0], [1], [0, 0, 1, 1], [], []>} : vector<300x32xf32>, vector<32x5xf32>, vector<300x5xf32> -> vector<300x5xf32>
    %c0_5 = arith.constant 0 : index
    %c0_6 = arith.constant 0 : index
    %5 = vector.load %arg3[%c0_5, %c0_6] : memref<1x5xf32, #tpu.memory_space<vmem>>, vector<1x5xf32>
    %6 = vector.broadcast %5 : vector<1x5xf32> to vector<300x5xf32>
    %7 = arith.addf %4, %6 : vector<300x5xf32>
    %8 = vector.broadcast %1 : f32 to vector<300x5xf32>
    %9 = arith.mulf %7, %8 : vector<300x5xf32>
    %c0_7 = arith.constant 0 : index
    %c0_8 = arith.constant 0 : index
    %10 = vector.load %arg4[%c0_7, %c0_8] : memref<300x5xf32, #tpu.memory_space<vmem>>, vector<300x5xf32>
    tpu.vector_store %arg4[%c0_7, %c0_8], %9 {strides = array<i32>} : memref<300x5xf32, #tpu.memory_space<vmem>>, vector<300x5xf32>,
    return
  }
}

</mosaic_0001>

<bundles_post_ra>
// kernel: tpu_custom_call.1
= control target key start
LH: loop header
LB: loop body
LE: loop exit
PB: predicated region body
PF: predicated region fallthrough
CT: control target
= control target key end

     0   :  { %vm71_vm0 = vcmask 261120   ;;  %vm480_vm1 = vcmask 39936   ;;  %vm518_vm2 = vcmask 35840   ;;  %s1112_s2 = inlined_call_operand.vmem [shape: f32[32,5], index: 2, kind: input, shape index: {}]   ;;  %s1113_s1 = inlined_call_operand.vmem [shape: f32[300,32], index: 1, kind: input, shape index: {}]   ;;  %s1114_s0 = inlined_call_operand.<no memory space> [shape: f32[1], index: 0, kind: input, shape index: {}]   ;;  %s1115_s3 = inlined_call_operand.vmem [shape: f32[1,5], index: 3, kind: input, shape index: {}]   ;;  %s1116_s4 = inlined_call_operand.vmem [shape: f32[300,5], index: 4, kind: output, shape index: {}]  }
   0x1   :  { %v60_v0 = vld [vmem:[%s1112_s2] sm:$0xff]  ;;  %v61_v1 = vld [vmem:[%s1112_s2 + $0x8] sm:$0xff]  ;;  %v62_v2 = vld [vmem:[%s1112_s2 + $0x10] sm:$0xff]  ;;  %v19_v3 = vstv %s1114_s0 }
   0x2   :  { %v670_v4 = vpack.c.bf16 %v61_v1, %v60_v0  ;;  %v63_v5 = vld [vmem:[%s1112_s2 + $0x18] sm:$0xff]  ;;  %v22_v6 = vld [vmem:[%s1113_s1] sm:$0xff]  ;;  %684 = vrcp.f32 %v19_v3  ;;  %v23_v9 = vld [vmem:[%s1113_s1 + $0x8] sm:$0xff] }
   0x3   :  { %v674_v7 = vpack.c.bf16 %v63_v5, %v62_v2  ;;  %613 = vmatprep.mubr.msk.f32.mxu0 %vm71_vm0, %v22_v6  ;;  %v42_v8 = vld [vmem:[%s1113_s1 + $0xa0] sm:$0xff]  ;;  %v43_v10 = vld [vmem:[%s1113_s1 + $0xa8] sm:$0xff]  ;;  %v24_v11 = vld [vmem:[%s1113_s1 + $0x10] sm:$0xff] }
   0x4   :  { %671 = vmatprep.subr.bf16.mxu0 %v670_v4  ;;  %678 = vmatprep.subr.bf16.mxu1 %v670_v4  ;;  %v44_v12 = vld [vmem:[%s1113_s1 + $0xb0] sm:$0xff]  ;;  %v25_v14 = vld [vmem:[%s1113_s1 + $0x18] sm:$0xff]  ;;  %v26_v16 = vld [vmem:[%s1113_s1 + $0x20] sm:$0xff] }
   0x5   :  { %673 = vmatpush3.bf16.msra.mxu0 %v670_v4  ;;  %680 = vmatpush3.bf16.msra.mxu1 %v670_v4  ;;  %v45_v15 = vld [vmem:[%s1113_s1 + $0xb8] sm:$0xff]  ;;  %v46_v17 = vld [vmem:[%s1113_s1 + $0xc0] sm:$0xff]  ;;  %v27_v18 = vld [vmem:[%s1113_s1 + $0x28] sm:$0xff] }
   0x6   :  { %675 = vmatprep.subr.bf16.mxu0 %v674_v7  ;;  %679 = vmatprep.subr.bf16.mxu1 %v674_v7  ;;  %v47_v19 = vld [vmem:[%s1113_s1 + $0xc8] sm:$0xff]  ;;  %v28_v20 = vld [vmem:[%s1113_s1 + $0x30] sm:$0xff]  ;;  %v29_v22 = vld [vmem:[%s1113_s1 + $0x38] sm:$0xff] }
   0x7   :  { %643 = vmatprep.mubr.msk.f32.mxu1 %vm71_vm0, %v42_v8  ;;  %v48_v21 = vld [vmem:[%s1113_s1 + $0xd0] sm:$0xff]  ;;  %v49_v23 = vld [vmem:[%s1113_s1 + $0xd8] sm:$0xff]  ;;  %v30_v24 = vld [vmem:[%s1113_s1 + $0x40] sm:$0xff] }
   0x8   :  { %v50_v25 = vld [vmem:[%s1113_s1 + $0xe0] sm:$0xff]  ;;  %v31_v26 = vld [vmem:[%s1113_s1 + $0x48] sm:$0xff]  ;;  %v32_v28 = vld [vmem:[%s1113_s1 + $0x50] sm:$0xff] }
   0x9   :  { %677 = vmatpush3.bf16.msra.mxu0 %v674_v7  ;;  %681 = vmatpush3.bf16.msra.mxu1 %v674_v7  ;;  %v51_v27 = vld [vmem:[%s1113_s1 + $0xe8] sm:$0xff]  ;;  %v52_v29 = vld [vmem:[%s1113_s1 + $0xf0] sm:$0xff]  ;;  %v33_v30 = vld [vmem:[%s1113_s1 + $0x58] sm:$0xff] }
   0xa   :  { %v53_v31 = vld [vmem:[%s1113_s1 + $0xf8] sm:$0xff]  ;;  %v34_v32 = vld [vmem:[%s1113_s1 + $0x60] sm:$0xff]  ;;  %v35_v34 = vld [vmem:[%s1113_s1 + $0x68] sm:$0xff] }
   0xb   :  { %v54_v33 = vld [vmem:[%s1113_s1 + $0x100] sm:$0xff]  ;;  %v55_v35 = vld [vmem:[%s1113_s1 + $0x108] sm:$0xff]  ;;  %v36_v36 = vld [vmem:[%s1113_s1 + $0x70] sm:$0xff] }
   0xc   :  { %v685_v13 = vpop.eup %684  ;;  %614 = vmatmul.mubr.msk.f32.vlgmr.msra.gmra.mrb[0].mxu0 %vm71_vm0, %v23_v9  ;;  %644 = vmatmul.mubr.msk.f32.vlgmr.msra.gmra.mrb[0].mxu1 %vm71_vm0, %v43_v10  ;;  %v56_v37 = vld [vmem:[%s1113_s1 + $0x110] sm:$0xff]  ;;  %v37_v38 = vld [vmem:[%s1113_s1 + $0x78] sm:$0xff]  ;;  %v38_v40 = vld [vmem:[%s1113_s1 + $0x80] sm:$0xff] }
   0xd   :  { %616 = vmatprep.mubr.msk.f32.mxu0 %vm71_vm0, %v24_v11  ;;  %646 = vmatprep.mubr.msk.f32.mxu1 %vm71_vm0, %v44_v12  ;;  %682 = vpush %v685_v13  ;;  %v57_v39 = vld [vmem:[%s1113_s1 + $0x118] sm:$0xff]  ;;  %v58_v41 = vld [vmem:[%s1113_s1 + $0x120] sm:$0xff]  ;;  %v39_v42 = vld [vmem:[%s1113_s1 + $0x88] sm:$0xff] }
   0xe   :  { %v59_v43 = vld [vmem:[%s1113_s1 + $0x128] sm:$0xf]  ;;  %v40_v44 = vld [vmem:[%s1113_s1 + $0x90] sm:$0xff]  ;;  %v41_v45 = vld [vmem:[%s1113_s1 + $0x98] sm:$0xff] }
   0xf   :  { %v881_v46 = vld [vmem:[%s1115_s3] ss:$0 sm:$0xff] }
  0x10   :  { %617 = vmatmul.mubr.msk.f32.gmra.mrb[2].mxu0 %vm71_vm0, %v25_v14  ;;  %647 = vmatmul.mubr.msk.f32.gmra.mrb[2].mxu1 %vm71_vm0, %v45_v15 }
  0x11   :  { %619 = vmatprep.mubr.msk.f32.mxu0 %vm71_vm0, %v26_v16  ;;  %649 = vmatprep.mubr.msk.f32.mxu1 %vm71_vm0, %v46_v17 }
  0x14   :  { %620 = vmatmul.mubr.msk.f32.gmra.mrb[4].mxu0 %vm71_vm0, %v27_v18  ;;  %650 = vmatmul.mubr.msk.f32.gmra.mrb[4].mxu1 %vm71_vm0, %v47_v19 }
  0x15   :  { %622 = vmatprep.mubr.msk.f32.mxu0 %vm71_vm0, %v28_v20  ;;  %652 = vmatprep.mubr.msk.f32.mxu1 %vm71_vm0, %v48_v21 }
  0x18   :  { %623 = vmatmul.mubr.msk.f32.gmra.mrb[6].mxu0 %vm71_vm0, %v29_v22  ;;  %653 = vmatmul.mubr.msk.f32.gmra.mrb[6].mxu1 %vm71_vm0, %v49_v23 }
  0x19   :  { %625 = vmatprep.mubr.msk.f32.mxu0 %vm71_vm0, %v30_v24  ;;  %655 = vmatprep.mubr.msk.f32.mxu1 %vm71_vm0, %v50_v25 }
  0x1c   :  { %626 = vmatmul.mubr.msk.f32.gmra.mrb[8].mxu0 %vm71_vm0, %v31_v26  ;;  %656 = vmatmul.mubr.msk.f32.gmra.mrb[8].mxu1 %vm71_vm0, %v51_v27 }
  0x1d   :  { %628 = vmatprep.mubr.msk.f32.mxu0 %vm71_vm0, %v32_v28  ;;  %658 = vmatprep.mubr.msk.f32.mxu1 %vm71_vm0, %v52_v29 }
  0x20   :  { %629 = vmatmul.mubr.msk.f32.gmra.mrb[10].mxu0 %vm71_vm0, %v33_v30  ;;  %659 = vmatmul.mubr.msk.f32.gmra.mrb[10].mxu1 %vm71_vm0, %v53_v31 }
  0x21   :  { %631 = vmatprep.mubr.msk.f32.mxu0 %vm71_vm0, %v34_v32  ;;  %661 = vmatprep.mubr.msk.f32.mxu1 %vm71_vm0, %v54_v33 }
  0x24   :  { %632 = vmatmul.mubr.msk.f32.gmra.mrb[12].mxu0 %vm71_vm0, %v35_v34  ;;  %662 = vmatmul.mubr.msk.f32.gmra.mrb[12].mxu1 %vm71_vm0, %v55_v35 }
  0x25   :  { %634 = vmatprep.mubr.msk.f32.mxu0 %vm71_vm0, %v36_v36  ;;  %664 = vmatprep.mubr.msk.f32.mxu1 %vm71_vm0, %v56_v37 }
  0x28   :  { %635 = vmatmul.mubr.msk.f32.gmra.mrb[14].mxu0 %vm71_vm0, %v37_v38  ;;  %665 = vmatmul.mubr.msk.f32.gmra.mrb[14].mxu1 %vm71_vm0, %v57_v39 }
  0x29   :  { %637 = vmatprep.mubr.msk.f32.mxu0 %vm71_vm0, %v38_v40  ;;  %667 = vmatprep.mubr.msk.f32.mxu1 %vm71_vm0, %v58_v41 }
  0x2c   :  { %638 = vmatmul.mubr.msk.f32.gmra.mrb[16].mxu0 %vm71_vm0, %v39_v42  ;;  %668 = vmatmul.mubr.msk.f32.gmra.mrb[16].mxu1 %vm71_vm0, %v59_v43 }
  0x2d   :  { %640 = vmatprep.mubr.msk.f32.mxu0 %vm71_vm0, %v40_v44 }
  0x30   :  { %641 = vmatmul.mubr.msk.f32.gmra.mrb[18].mxu0 %vm71_vm0, %v41_v45 }
  0x3e   :  { %s683_s17 = spop %682 }
  0x3f   :  { %v883_v48 = vstv %s683_s17 }
  0xdf   :  { %v615_v47 = vpop.f32.mrb[0].mxu0  ;;  %v645_v49 = vpop.f32.mrb[0].mxu1 }
  0xe0   :  { %v258_v50 = vadd.f32 %v615_v47, %v881_v46  ;;  %v252_v51 = vpop.f32.mrb[1].mxu0  ;;  %v358_v52 = vadd.f32 %v645_v49, %v881_v46  ;;  %v352_v53 = vpop.f32.mrb[1].mxu1 }
  0xe1   :  { %v253_v54 = vadd.f32 %v881_v46, %v252_v51  ;;  %v353_v55 = vadd.f32 %v881_v46, %v352_v53 }
  0xe2   :  { %v443_v56 = vmul.f32 %v883_v48, %v258_v50  ;;  %v463_v57 = vmul.f32 %v883_v48, %v358_v52 }
  0xe3   :  { %v442_v58 = vmul.f32 %v883_v48, %v253_v54  ;;  %v618_v59 = vpop.f32.mrb[2].mxu0  ;;  %v462_v60 = vmul.f32 %v883_v48, %v353_v55  ;;  %v648_v61 = vpop.f32.mrb[2].mxu1 }
  0xe4   :  { %482 = vst.msk [vmem:[%s1116_s4 + $0x8] sm:$0xff] %vm480_vm1, %v443_v56  ;;  %502 = vst.msk [vmem:[%s1116_s4 + $0xa8] sm:$0xff] %vm480_vm1, %v463_v57  ;;  %v268_v62 = vadd.f32 %v618_v59, %v881_v46  ;;  %v262_v63 = vpop.f32.mrb[3].mxu0  ;;  %v368_v0 = vadd.f32 %v648_v61, %v881_v46  ;;  %v362_v1 = vpop.f32.mrb[3].mxu1 }
  0xe5   :  { %481 = vst.msk [vmem:[%s1116_s4] sm:$0xff] %vm480_vm1, %v442_v58  ;;  %501 = vst.msk [vmem:[%s1116_s4 + $0xa0] sm:$0xff] %vm480_vm1, %v462_v60  ;;  %v263_v2 = vadd.f32 %v881_v46, %v262_v63  ;;  %v363_v3 = vadd.f32 %v881_v46, %v362_v1 }
  0xe6   :  { %v445_v4 = vmul.f32 %v883_v48, %v268_v62  ;;  %v465_v5 = vmul.f32 %v883_v48, %v368_v0 }
  0xe7   :  { %v444_v6 = vmul.f32 %v883_v48, %v263_v2  ;;  %v621_v7 = vpop.f32.mrb[4].mxu0  ;;  %v464_v8 = vmul.f32 %v883_v48, %v363_v3  ;;  %v651_v9 = vpop.f32.mrb[4].mxu1 }
  0xe8   :  { %484 = vst.msk [vmem:[%s1116_s4 + $0x18] sm:$0xff] %vm480_vm1, %v445_v4  ;;  %504 = vst.msk [vmem:[%s1116_s4 + $0xb8] sm:$0xff] %vm480_vm1, %v465_v5  ;;  %v278_v10 = vadd.f32 %v621_v7, %v881_v46  ;;  %v272_v11 = vpop.f32.mrb[5].mxu0  ;;  %v378_v12 = vadd.f32 %v651_v9, %v881_v46  ;;  %v372_v13 = vpop.f32.mrb[5].mxu1 }
  0xe9   :  { %483 = vst.msk [vmem:[%s1116_s4 + $0x10] sm:$0xff] %vm480_vm1, %v444_v6  ;;  %503 = vst.msk [vmem:[%s1116_s4 + $0xb0] sm:$0xff] %vm480_vm1, %v464_v8  ;;  %v273_v14 = vadd.f32 %v881_v46, %v272_v11  ;;  %v373_v15 = vadd.f32 %v881_v46, %v372_v13 }
  0xea   :  { %v447_v16 = vmul.f32 %v883_v48, %v278_v10  ;;  %v467_v17 = vmul.f32 %v883_v48, %v378_v12 }
  0xeb   :  { %v446_v18 = vmul.f32 %v883_v48, %v273_v14  ;;  %v624_v19 = vpop.f32.mrb[6].mxu0  ;;  %v466_v20 = vmul.f32 %v883_v48, %v373_v15  ;;  %v654_v21 = vpop.f32.mrb[6].mxu1 }
  0xec   :  { %486 = vst.msk [vmem:[%s1116_s4 + $0x28] sm:$0xff] %vm480_vm1, %v447_v16  ;;  %506 = vst.msk [vmem:[%s1116_s4 + $0xc8] sm:$0xff] %vm480_vm1, %v467_v17  ;;  %v288_v22 = vadd.f32 %v624_v19, %v881_v46  ;;  %v282_v23 = vpop.f32.mrb[7].mxu0  ;;  %v388_v24 = vadd.f32 %v654_v21, %v881_v46  ;;  %v382_v25 = vpop.f32.mrb[7].mxu1 }
  0xed   :  { %485 = vst.msk [vmem:[%s1116_s4 + $0x20] sm:$0xff] %vm480_vm1, %v446_v18  ;;  %505 = vst.msk [vmem:[%s1116_s4 + $0xc0] sm:$0xff] %vm480_vm1, %v466_v20  ;;  %v283_v26 = vadd.f32 %v881_v46, %v282_v23  ;;  %v383_v27 = vadd.f32 %v881_v46, %v382_v25 }
  0xee   :  { %v449_v28 = vmul.f32 %v883_v48, %v288_v22  ;;  %v469_v29 = vmul.f32 %v883_v48, %v388_v24 }
  0xef   :  { %v448_v30 = vmul.f32 %v883_v48, %v283_v26  ;;  %v627_v31 = vpop.f32.mrb[8].mxu0  ;;  %v468_v32 = vmul.f32 %v883_v48, %v383_v27  ;;  %v657_v33 = vpop.f32.mrb[8].mxu1 }
  0xf0   :  { %488 = vst.msk [vmem:[%s1116_s4 + $0x38] sm:$0xff] %vm480_vm1, %v449_v28  ;;  %508 = vst.msk [vmem:[%s1116_s4 + $0xd8] sm:$0xff] %vm480_vm1, %v469_v29  ;;  %v298_v34 = vadd.f32 %v627_v31, %v881_v46  ;;  %v292_v35 = vpop.f32.mrb[9].mxu0  ;;  %v398_v36 = vadd.f32 %v657_v33, %v881_v46  ;;  %v392_v37 = vpop.f32.mrb[9].mxu1 }
  0xf1   :  { %487 = vst.msk [vmem:[%s1116_s4 + $0x30] sm:$0xff] %vm480_vm1, %v448_v30  ;;  %507 = vst.msk [vmem:[%s1116_s4 + $0xd0] sm:$0xff] %vm480_vm1, %v468_v32  ;;  %v293_v38 = vadd.f32 %v881_v46, %v292_v35  ;;  %v393_v39 = vadd.f32 %v881_v46, %v392_v37 }
  0xf2   :  { %v451_v40 = vmul.f32 %v883_v48, %v298_v34  ;;  %v471_v41 = vmul.f32 %v883_v48, %v398_v36 }
  0xf3   :  { %v450_v42 = vmul.f32 %v883_v48, %v293_v38  ;;  %v630_v43 = vpop.f32.mrb[10].mxu0  ;;  %v470_v44 = vmul.f32 %v883_v48, %v393_v39  ;;  %v660_v45 = vpop.f32.mrb[10].mxu1 }
  0xf4   :  { %490 = vst.msk [vmem:[%s1116_s4 + $0x48] sm:$0xff] %vm480_vm1, %v451_v40  ;;  %510 = vst.msk [vmem:[%s1116_s4 + $0xe8] sm:$0xff] %vm480_vm1, %v471_v41  ;;  %v308_v47 = vadd.f32 %v630_v43, %v881_v46  ;;  %v302_v49 = vpop.f32.mrb[11].mxu0  ;;  %v408_v50 = vadd.f32 %v660_v45, %v881_v46  ;;  %v402_v51 = vpop.f32.mrb[11].mxu1 }
  0xf5   :  { %489 = vst.msk [vmem:[%s1116_s4 + $0x40] sm:$0xff] %vm480_vm1, %v450_v42  ;;  %509 = vst.msk [vmem:[%s1116_s4 + $0xe0] sm:$0xff] %vm480_vm1, %v470_v44  ;;  %v303_v52 = vadd.f32 %v881_v46, %v302_v49  ;;  %v403_v53 = vadd.f32 %v881_v46, %v402_v51 }
  0xf6   :  { %v453_v54 = vmul.f32 %v883_v48, %v308_v47  ;;  %v473_v55 = vmul.f32 %v883_v48, %v408_v50 }
  0xf7   :  { %v452_v56 = vmul.f32 %v883_v48, %v303_v52  ;;  %v633_v57 = vpop.f32.mrb[12].mxu0  ;;  %v472_v58 = vmul.f32 %v883_v48, %v403_v53  ;;  %v663_v59 = vpop.f32.mrb[12].mxu1 }
  0xf8   :  { %492 = vst.msk [vmem:[%s1116_s4 + $0x58] sm:$0xff] %vm480_vm1, %v453_v54  ;;  %512 = vst.msk [vmem:[%s1116_s4 + $0xf8] sm:$0xff] %vm480_vm1, %v473_v55  ;;  %v318_v60 = vadd.f32 %v633_v57, %v881_v46  ;;  %v312_v61 = vpop.f32.mrb[13].mxu0  ;;  %v418_v62 = vadd.f32 %v663_v59, %v881_v46  ;;  %v412_v63 = vpop.f32.mrb[13].mxu1 }
  0xf9   :  { %491 = vst.msk [vmem:[%s1116_s4 + $0x50] sm:$0xff] %vm480_vm1, %v452_v56  ;;  %511 = vst.msk [vmem:[%s1116_s4 + $0xf0] sm:$0xff] %vm480_vm1, %v472_v58  ;;  %v313_v0 = vadd.f32 %v881_v46, %v312_v61  ;;  %v413_v1 = vadd.f32 %v881_v46, %v412_v63 }
  0xfa   :  { %v455_v2 = vmul.f32 %v883_v48, %v318_v60  ;;  %v475_v3 = vmul.f32 %v883_v48, %v418_v62 }
  0xfb   :  { %v454_v4 = vmul.f32 %v883_v48, %v313_v0  ;;  %v636_v5 = vpop.f32.mrb[14].mxu0  ;;  %v474_v6 = vmul.f32 %v883_v48, %v413_v1  ;;  %v666_v7 = vpop.f32.mrb[14].mxu1 }
  0xfc   :  { %494 = vst.msk [vmem:[%s1116_s4 + $0x68] sm:$0xff] %vm480_vm1, %v455_v2  ;;  %514 = vst.msk [vmem:[%s1116_s4 + $0x108] sm:$0xff] %vm480_vm1, %v475_v3  ;;  %v328_v8 = vadd.f32 %v636_v5, %v881_v46  ;;  %v322_v9 = vpop.f32.mrb[15].mxu0  ;;  %v428_v10 = vadd.f32 %v666_v7, %v881_v46  ;;  %v422_v11 = vpop.f32.mrb[15].mxu1 }
  0xfd   :  { %493 = vst.msk [vmem:[%s1116_s4 + $0x60] sm:$0xff] %vm480_vm1, %v454_v4  ;;  %513 = vst.msk [vmem:[%s1116_s4 + $0x100] sm:$0xff] %vm480_vm1, %v474_v6  ;;  %v323_v12 = vadd.f32 %v881_v46, %v322_v9  ;;  %v423_v13 = vadd.f32 %v881_v46, %v422_v11 }
  0xfe   :  { %v457_v14 = vmul.f32 %v883_v48, %v328_v8  ;;  %v477_v15 = vmul.f32 %v883_v48, %v428_v10 }
  0xff   :  { %v456_v16 = vmul.f32 %v883_v48, %v323_v12  ;;  %v639_v17 = vpop.f32.mrb[16].mxu0  ;;  %v476_v18 = vmul.f32 %v883_v48, %v423_v13  ;;  %v669_v19 = vpop.f32.mrb[16].mxu1 }
 0x100   :  { %496 = vst.msk [vmem:[%s1116_s4 + $0x78] sm:$0xff] %vm480_vm1, %v457_v14  ;;  %516 = vst.msk [vmem:[%s1116_s4 + $0x118] sm:$0xff] %vm480_vm1, %v477_v15  ;;  %v338_v20 = vadd.f32 %v639_v17, %v881_v46  ;;  %v332_v21 = vpop.f32.mrb[17].mxu0  ;;  %v438_v22 = vadd.f32 %v669_v19, %v881_v46  ;;  %v432_v23 = vpop.f32.mrb[17].mxu1 }
 0x101   :  { %495 = vst.msk [vmem:[%s1116_s4 + $0x70] sm:$0xff] %vm480_vm1, %v456_v16  ;;  %515 = vst.msk [vmem:[%s1116_s4 + $0x110] sm:$0xff] %vm480_vm1, %v476_v18  ;;  %v333_v24 = vadd.f32 %v881_v46, %v332_v21  ;;  %v433_v25 = vadd.f32 %v881_v46, %v432_v23 }
 0x102   :  { %v459_v26 = vmul.f32 %v883_v48, %v338_v20  ;;  %v479_v27 = vmul.f32 %v883_v48, %v438_v22 }
 0x103   :  { %v458_v28 = vmul.f32 %v883_v48, %v333_v24  ;;  %v642_v29 = vpop.f32.mrb[18].mxu0  ;;  %v478_v30 = vmul.f32 %v883_v48, %v433_v25 }
 0x104   :  { %498 = vst.msk [vmem:[%s1116_s4 + $0x88] sm:$0xff] %vm480_vm1, %v459_v26  ;;  %v348_v31 = vadd.f32 %v642_v29, %v881_v46  ;;  %v342_v32 = vpop.f32.mrb[19].mxu0 }
 0x105   :  { %519 = vst.msk [vmem:[%s1116_s4 + $0x128] sm:$0xf] %vm518_vm2, %v479_v27  ;;  %v343_v33 = vadd.f32 %v881_v46, %v342_v32 }
 0x106   :  { %497 = vst.msk [vmem:[%s1116_s4 + $0x80] sm:$0xff] %vm480_vm1, %v458_v28  ;;  %517 = vst.msk [vmem:[%s1116_s4 + $0x120] sm:$0xff] %vm480_vm1, %v478_v30  ;;  %v461_v34 = vmul.f32 %v883_v48, %v348_v31 }
 0x107   :  { %v460_v35 = vmul.f32 %v883_v48, %v343_v33 }
 0x108   :  { %500 = vst.msk [vmem:[%s1116_s4 + $0x98] sm:$0xff] %vm480_vm1, %v461_v34 }
 0x109   :  { %499 = vst.msk [vmem:[%s1116_s4 + $0x90] sm:$0xff] %vm480_vm1, %v460_v35 }

</bundles_post_ra>
